<compile_context>
chip_gen: v7x
topology: tpu7x:2x2x1
jax: 0.10.0
libtpu: 0.0.40
codegen_flags: <defaults>
</compile_context>

<pallas_src>
import functools
import math

import jax
import jax.numpy as jnp
from jax import lax
from jax.experimental import pallas as pl
from jax.experimental.pallas import tpu as pltpu


def _siren_fused_kernel(x_ref, *refs, num_linears, chunk):
    """Fused Siren MLP over one batch tile (feature-major layout).

    x_ref : (F_in, TILE_N)
    refs  : (w0, b0, w1, b1, ..., w_{L-1}, b_{L-1}, o_ref)
            w_l: (F_out, F_in) (PyTorch layout), b_l: (F_out, 1),
            o_ref: (F_out_last, TILE_N).
    """
    o_ref = refs[-1]
    wb_refs = refs[:-1]
    tile = x_ref.shape[-1]
    n_chunks = tile // chunk

    # Weights/biases are tiny (<= 32x32); load once per grid step, hoisted out
    # of the lane-chunk loop, so the chain inside the loop stays in registers.
    ws = [wb_refs[2 * l][...].astype(jnp.float32) for l in range(num_linears)]
    bs = [wb_refs[2 * l + 1][...].astype(jnp.float32) for l in range(num_linears)]

    def chunk_body(c, carry):
        j = pl.multiple_of(c * chunk, chunk)                  # chunk % 128 == 0
        h = x_ref[:, pl.ds(j, chunk)].astype(jnp.float32)     # (F_in, chunk)
        for l in range(num_linears):                          # unrolled at trace
            # Small W is the first operand -> MXU-stationary operand is the
            # tiny reused weight, not the large activation chunk.
            y = jnp.dot(ws[l], h, preferred_element_type=jnp.float32) + bs[l]
            # omega_0 already folded into w, b:
            #   relu(omega*(Wx+b)) == relu((omega*W)x + omega*b)
            h = jnp.maximum(y, 0.0) if l < num_linears - 1 else y
        o_ref[:, pl.ds(j, chunk)] = h.astype(o_ref.dtype)
        return carry

    lax.fori_loop(0, n_chunks, chunk_body, 0, unroll=True)


def init_siren_params(key, in_features, hidden_features, hidden_layers,
                      out_features):
    """nn.Linear default init: W, b ~ U(-1/sqrt(fan_in), 1/sqrt(fan_in)).

    Weights stored in the PyTorch (out_features, in_features) layout.
    """
    dims = ([in_features] + [hidden_features] * (hidden_layers + 1)
            + [out_features])
    params = []
    for fin, fout in zip(dims[:-1], dims[1:]):
        key, kw, kb = jax.random.split(key, 3)
        bound = 1.0 / math.sqrt(fin)
        w = jax.random.uniform(kw, (fout, fin), jnp.float32, -bound, bound)
        b = jax.random.uniform(kb, (fout,), jnp.float32, -bound, bound)
        params.append((w, b))
    return params


def siren_forward(params, coords, omega_0=1.0, *,
                  max_tile_n=16384, target_steps=8, chunk_n=512):
    """coords: (N, in_features) -> (N, out_features). Single fused Pallas call."""
    n, fin = coords.shape
    num_linears = len(params)
    fout_last = params[-1][0].shape[0]

    # Fold omega_0 into every layer except the final plain linear.
    flat_inputs, wb_specs = [], []
    for li, (w, b) in enumerate(params):
        scale = 1.0 if li == num_linears - 1 else float(omega_0)
        w_s = (w * scale).astype(jnp.float32)
        b_s = (b * scale).astype(jnp.float32).reshape(w.shape[0], 1)
        flat_inputs += [w_s, b_s]
        # Constant index_maps -> weights/biases resident in VMEM across the grid.
        wb_specs += [pl.BlockSpec(w_s.shape, lambda i: (0, 0)),
                     pl.BlockSpec(b_s.shape, lambda i: (0, 0))]

    # Tile selection: ~N/target_steps lanes per block, rounded to 128, clamped
    # to [128, max_tile_n], then snapped to a multiple of the in-kernel lane
    # chunk so the chunk loop divides evenly.  Keeps >=2 grid steps for small N
    # and minimizes n_pad - n (no power-of-two padding blowup).
    tile = pl.cdiv(n, target_steps)
    tile = max(128, min(pl.cdiv(tile, 128) * 128, int(max_tile_n)))
    if tile >= chunk_n:
        chunk = int(chunk_n)
        tile = pl.cdiv(tile, chunk) * chunk
    else:
        chunk = tile
    n_pad = pl.cdiv(n, tile) * tile

    # Feature-major input; single pad op (no zeros+scatter extra HBM pass).
    x_t = jnp.pad(coords.T.astype(jnp.float32), ((0, 0), (0, n_pad - n)))

    # VMEM budget: double-buffered in/out blocks + resident weights + chunk
    # intermediates, with 2x headroom; capped well under v7x's 64 MiB physical.
    wb_bytes = sum(a.size * 4 for a in flat_inputs)
    io_bytes = 2 * fin * tile * 4 + 2 * max(fout_last, 8) * tile * 4
    hidden_max = max(w.shape[0] for w, _ in params)
    scratch_bytes = 4 * hidden_max * chunk * 4
    vmem_limit = int(min(max(2 * (2 * wb_bytes + io_bytes + scratch_bytes),
                             8 << 20), 32 << 20))

    kernel = functools.partial(_siren_fused_kernel,
                               num_linears=num_linears, chunk=chunk)

    out_t = pl.pallas_call(
        kernel,
        out_shape=jax.ShapeDtypeStruct((fout_last, n_pad), jnp.float32),
        grid_spec=pltpu.PrefetchScalarGridSpec(
            num_scalar_prefetch=0,
            grid=(n_pad // tile,),
            in_specs=[pl.BlockSpec((fin, tile), lambda i: (0, i))] + wb_specs,
            out_specs=pl.BlockSpec((fout_last, tile), lambda i: (0, i)),
        ),
        compiler_params=pltpu.CompilerParams(
            # Batch-parallel over N: pipelined, shardable across both TCs on v7x.
            dimension_semantics=("parallel",),
            vmem_limit_bytes=vmem_limit,
        ),
    )(x_t, *flat_inputs)

    return out_t[:, :n].T


if __name__ == "__main__":
    # TODO(synk): coords.clone().detach().requires_grad_(True) in the torch
    # forward is autograd bookkeeping only; no effect on forward values.
    key = jax.random.PRNGKey(0)
    k_inp, k_par = jax.random.split(key)

    # Small shapes consistent with the module.
    batch = 300            # not a multiple of 128 -> exercises padding; 3 grid steps
    in_features = 2
    hidden_features = 32
    hidden_layers = 2
    out_features = 1
    omega_0 = 1.0          # Siren's default omega_0

    coords = jax.random.normal(k_inp, (batch, in_features), jnp.float32)
    params = init_siren_params(k_par, in_features, hidden_features,
                               hidden_layers, out_features)

    out = siren_forward(params, coords, omega_0=omega_0)
    jax.block_until_ready(out)
    assert out.shape == (batch, out_features)

    # Plain-JAX reference (torch semantics): relu(omega * linear) ... final linear.
    ref = coords
    for li, (w, b) in enumerate(params):
        y = ref @ w.T + b
        if li < len(params) - 1:
            y = jnp.maximum(omega_0 * y, 0.0)
        ref = y
    max_err = float(jnp.max(jnp.abs(out - ref)))
    assert jnp.allclose(out, ref, rtol=1e-5, atol=1e-5), max_err

    print("KERNEL_OK")
</pallas_src>

<mosaic_0001>
module attributes {stable_mosaic.version = 11 : i64} {
  func.func @_siren_fused_kernel(%arg0: i32, %arg1: memref<2x128xf32, #tpu.memory_space<vmem>>, %arg2: memref<32x2xf32, #tpu.memory_space<vmem>>, %arg3: memref<32x1xf32, #tpu.memory_space<vmem>>, %arg4: memref<32x32xf32, #tpu.memory_space<vmem>>, %arg5: memref<32x1xf32, #tpu.memory_space<vmem>>, %arg6: memref<32x32xf32, #tpu.memory_space<vmem>>, %arg7: memref<32x1xf32, #tpu.memory_space<vmem>>, %arg8: memref<1x32xf32, #tpu.memory_space<vmem>>, %arg9: memref<1x1xf32, #tpu.memory_space<vmem>>, %arg10: memref<1x128xf32, #tpu.memory_space<vmem>>) attributes {dimension_semantics = [#tpu.dimension_semantics<parallel>], iteration_bounds = array<i64: 3>, scalar_prefetch = 0 : i64, scratch_operands = 0 : i64, tpu.core_type = #tpu.core_type<tc>, window_params = [{transform_indices = @transform_0, window_bounds = array<i64: 2, 128>}, {pipeline_mode = #tpu.pipeline_mode<synchronous>, transform_indices = @transform_1, window_bounds = array<i64: 32, 2>}, {pipeline_mode = #tpu.pipeline_mode<synchronous>, transform_indices = @transform_2, window_bounds = array<i64: 32, 1>}, {pipeline_mode = #tpu.pipeline_mode<synchronous>, transform_indices = @transform_3, window_bounds = array<i64: 32, 32>}, {pipeline_mode = #tpu.pipeline_mode<synchronous>, transform_indices = @transform_4, window_bounds = array<i64: 32, 1>}, {pipeline_mode = #tpu.pipeline_mode<synchronous>, transform_indices = @transform_5, window_bounds = array<i64: 32, 32>}, {pipeline_mode = #tpu.pipeline_mode<synchronous>, transform_indices = @transform_6, window_bounds = array<i64: 32, 1>}, {pipeline_mode = #tpu.pipeline_mode<synchronous>, transform_indices = @transform_7, window_bounds = array<i64: 1, 32>}, {pipeline_mode = #tpu.pipeline_mode<synchronous>, transform_indices = @transform_8, window_bounds = array<i64: 1, 1>}, {transform_indices = @transform_9, window_bounds = array<i64: 1, 128>}]} {
    %c0 = arith.constant 0 : index
    %c0_0 = arith.constant 0 : index
    %0 = vector.load %arg2[%c0, %c0_0] : memref<32x2xf32, #tpu.memory_space<vmem>>, vector<32x2xf32>
    %c0_1 = arith.constant 0 : index
    %c0_2 = arith.constant 0 : index
    %1 = vector.load %arg4[%c0_1, %c0_2] : memref<32x32xf32, #tpu.memory_space<vmem>>, vector<32x32xf32>
    %c0_3 = arith.constant 0 : index
    %c0_4 = arith.constant 0 : index
    %2 = vector.load %arg6[%c0_3, %c0_4] : memref<32x32xf32, #tpu.memory_space<vmem>>, vector<32x32xf32>
    %c0_5 = arith.constant 0 : index
    %c0_6 = arith.constant 0 : index
    %3 = vector.load %arg8[%c0_5, %c0_6] : memref<1x32xf32, #tpu.memory_space<vmem>>, vector<1x32xf32>
    %c0_7 = arith.constant 0 : index
    %c0_8 = arith.constant 0 : index
    %4 = vector.load %arg3[%c0_7, %c0_8] : memref<32x1xf32, #tpu.memory_space<vmem>>, vector<32x1xf32>
    %c0_9 = arith.constant 0 : index
    %c0_10 = arith.constant 0 : index
    %5 = vector.load %arg5[%c0_9, %c0_10] : memref<32x1xf32, #tpu.memory_space<vmem>>, vector<32x1xf32>
    %c0_11 = arith.constant 0 : index
    %c0_12 = arith.constant 0 : index
    %6 = vector.load %arg7[%c0_11, %c0_12] : memref<32x1xf32, #tpu.memory_space<vmem>>, vector<32x1xf32>
    %c0_13 = arith.constant 0 : index
    %c0_14 = arith.constant 0 : index
    %7 = vector.load %arg9[%c0_13, %c0_14] : memref<1x1xf32, #tpu.memory_space<vmem>>, vector<1x1xf32>
    %c0_i32 = arith.constant 0 : i32
    %c128_i32 = arith.constant 128 : i32
    %8 = arith.muli %c0_i32, %c128_i32 : i32
    %9 = tpu.assume_multiple %8, 128 : i32
    %c0_15 = arith.constant 0 : index
    %10 = arith.index_cast %9 : i32 to index
    %11 = vector.load %arg1[%c0_15, %10] : memref<2x128xf32, #tpu.memory_space<vmem>>, vector<2x128xf32>
    %cst = arith.constant dense<0.000000e+00> : vector<32x128xf32>
    %12 = tpu.matmul %0, %11, %cst {dimension_numbers = #tpu.dot_dimension_numbers<[1], [0], [0], [1], [0, 0, 1, 1], [], []>} : vector<32x2xf32>, vector<2x128xf32>, vector<32x128xf32> -> vector<32x128xf32>
    %13 = vector.broadcast %4 : vector<32x1xf32> to vector<32x128xf32>
    %14 = arith.addf %12, %13 : vector<32x128xf32>
    %cst_16 = arith.constant 0.000000e+00 : f32
    %15 = vector.broadcast %cst_16 : f32 to vector<32x128xf32>
    %16 = arith.maximumf %14, %15 : vector<32x128xf32>
    %cst_17 = arith.constant dense<0.000000e+00> : vector<32x128xf32>
    %17 = tpu.matmul %1, %16, %cst_17 {dimension_numbers = #tpu.dot_dimension_numbers<[1], [0], [0], [1], [0, 0, 1, 1], [], []>} : vector<32x32xf32>, vector<32x128xf32>, vector<32x128xf32> -> vector<32x128xf32>
    %18 = vector.broadcast %5 : vector<32x1xf32> to vector<32x128xf32>
    %19 = arith.addf %17, %18 : vector<32x128xf32>
    %cst_18 = arith.constant 0.000000e+00 : f32
    %20 = vector.broadcast %cst_18 : f32 to vector<32x128xf32>
    %21 = arith.maximumf %19, %20 : vector<32x128xf32>
    %cst_19 = arith.constant dense<0.000000e+00> : vector<32x128xf32>
    %22 = tpu.matmul %2, %21, %cst_19 {dimension_numbers = #tpu.dot_dimension_numbers<[1], [0], [0], [1], [0, 0, 1, 1], [], []>} : vector<32x32xf32>, vector<32x128xf32>, vector<32x128xf32> -> vector<32x128xf32>
    %23 = vector.broadcast %6 : vector<32x1xf32> to vector<32x128xf32>
    %24 = arith.addf %22, %23 : vector<32x128xf32>
    %cst_20 = arith.constant 0.000000e+00 : f32
    %25 = vector.broadcast %cst_20 : f32 to vector<32x128xf32>
    %26 = arith.maximumf %24, %25 : vector<32x128xf32>
    %cst_21 = arith.constant dense<0.000000e+00> : vector<1x128xf32>
    %27 = tpu.matmul %3, %26, %cst_21 {dimension_numbers = #tpu.dot_dimension_numbers<[1], [0], [0], [1], [0, 0, 1, 1], [], []>} : vector<1x32xf32>, vector<32x128xf32>, vector<1x128xf32> -> vector<1x128xf32>
    %28 = vector.broadcast %7 : vector<1x1xf32> to vector<1x128xf32>
    %29 = arith.addf %27, %28 : vector<1x128xf32>
    %c0_22 = arith.constant 0 : index
    %30 = arith.index_cast %9 : i32 to index
    %31 = vector.load %arg10[%c0_22, %30] : memref<1x128xf32, #tpu.memory_space<vmem>>, vector<1x128xf32>
    tpu.vector_store %arg10[%c0_22, %30], %29 {strides = array<i32>} : memref<1x128xf32, #tpu.memory_space<vmem>>, vector<1x128xf32>,
    %c1_i32 = arith.constant 1 : i32
    return
  }
  func.func @transform_0(%arg0: i32) -> (i32, i32) {
    %c0_i32 = arith.constant 0 : i32
    %c0_i32_0 = arith.constant 0 : i32
    return %c0_i32, %arg0 : i32, i32
  }
  func.func @transform_1(%arg0: i32) -> (i32, i32) {
    %c0_i32 = arith.constant 0 : i32
    %c0_i32_0 = arith.constant 0 : i32
    %c0_i32_1 = arith.constant 0 : i32
    return %c0_i32, %c0_i32_0 : i32, i32
  }
  func.func @transform_2(%arg0: i32) -> (i32, i32) {
    %c0_i32 = arith.constant 0 : i32
    %c0_i32_0 = arith.constant 0 : i32
    %c0_i32_1 = arith.constant 0 : i32
    return %c0_i32, %c0_i32_0 : i32, i32
  }
  func.func @transform_3(%arg0: i32) -> (i32, i32) {
    %c0_i32 = arith.constant 0 : i32
    %c0_i32_0 = arith.constant 0 : i32
    %c0_i32_1 = arith.constant 0 : i32
    return %c0_i32, %c0_i32_0 : i32, i32
  }
  func.func @transform_4(%arg0: i32) -> (i32, i32) {
    %c0_i32 = arith.constant 0 : i32
    %c0_i32_0 = arith.constant 0 : i32
    %c0_i32_1 = arith.constant 0 : i32
    return %c0_i32, %c0_i32_0 : i32, i32
  }
  func.func @transform_5(%arg0: i32) -> (i32, i32) {
    %c0_i32 = arith.constant 0 : i32
    %c0_i32_0 = arith.constant 0 : i32
    %c0_i32_1 = arith.constant 0 : i32
    return %c0_i32, %c0_i32_0 : i32, i32
  }
  func.func @transform_6(%arg0: i32) -> (i32, i32) {
    %c0_i32 = arith.constant 0 : i32
    %c0_i32_0 = arith.constant 0 : i32
    %c0_i32_1 = arith.constant 0 : i32
    return %c0_i32, %c0_i32_0 : i32, i32
  }
  func.func @transform_7(%arg0: i32) -> (i32, i32) {
    %c0_i32 = arith.constant 0 : i32
    %c0_i32_0 = arith.constant 0 : i32
    %c0_i32_1 = arith.constant 0 : i32
    return %c0_i32, %c0_i32_0 : i32, i32
  }
  func.func @transform_8(%arg0: i32) -> (i32, i32) {
    %c0_i32 = arith.constant 0 : i32
    %c0_i32_0 = arith.constant 0 : i32
    %c0_i32_1 = arith.constant 0 : i32
    return %c0_i32, %c0_i32_0 : i32, i32
  }
  func.func @transform_9(%arg0: i32) -> (i32, i32) {
    %c0_i32 = arith.constant 0 : i32
    %c0_i32_0 = arith.constant 0 : i32
    return %c0_i32, %arg0 : i32, i32
  }
}

</mosaic_0001>

<bundles_post_ra>
// kernel: tpu_custom_call.1
= control target key start
LH: loop header
LB: loop body
LE: loop exit
PB: predicated region body
PF: predicated region fallthrough
CT: control target
= control target key end

     0   :  { %s1348_s0 = inlined_call_operand.vmem [shape: f32[2,384], index: 0, kind: input, shape index: {}]   ;;  %s1349_s1 = inlined_call_operand.vmem [shape: f32[32,2], index: 1, kind: input, shape index: {}]   ;;  %s1350_s2 = inlined_call_operand.vmem [shape: f32[32,1], index: 2, kind: input, shape index: {}]   ;;  %s1351_s3 = inlined_call_operand.vmem [shape: f32[32,32], index: 3, kind: input, shape index: {}]   ;;  %s1352_s4 = inlined_call_operand.vmem [shape: f32[32,1], index: 4, kind: input, shape index: {}]   ;;  %s1353_s5 = inlined_call_operand.vmem [shape: f32[32,32], index: 5, kind: input, shape index: {}]   ;;  %s1354_s6 = inlined_call_operand.vmem [shape: f32[32,1], index: 6, kind: input, shape index: {}]   ;;  %s1355_s7 = inlined_call_operand.vmem [shape: f32[1,32], index: 7, kind: input, shape index: {}]   ;;  %s1356_s8 = inlined_call_operand.<no memory space> [shape: f32[1,1], index: 8, kind: input, shape index: {}]   ;;  %s1357_s9 = inlined_call_operand.hbm [shape: f32[1,384], index: 9, kind: output, shape index: {}]  }
   0x1   :  { %v14_v0 = vstv %s1356_s8 }
   0x2   :  { %15 = vst [vmem:[#allocation2] sm:$0x1] %v14_v0 }
   0x3   :  { %16 = vsyncpa [#allocation4], 0 }
   0x4   :  { %18 = vsyncpa [#allocation4 + $0x1], 0  ;;  %s1160_s11 = smov 0   ;;  %s1162_s12 = smov 0  }
   0x5   :  { %s1164_s13 = smov 0   ;;  %s1166_s14 = smov 0  }
   0x6 LB: > { %s1181_s8 = sadd.s32 4294967295, %s1100_s14   ;;  %s876_s15 = sadd.s32 4294967294, %s1100_s14   ;;  %s1100_s14 = sphi %s1166_s14, %s1363_s14   ;;  %s1096_s13 = sphi %s1164_s13, %s1362_s13   ;;  %s1092_s12 = sphi %s1162_s12, %s1361_s12   ;;  %s1088_s11 = sphi %s1160_s11, %s1360_s11  }
   0x7   : > { %s1185_s16 = sadd.s32 1, %s1100_s14   ;;  %s225_s17 = sadd.s32 1, %s1096_s13 }
   0x8   : > { %s222_s18 = ssub.s32 %s1100_s14, %s1185_s16  ;;  %p235_p0 = scmp.ne.s32.totalorder %s1096_s13, %s1092_s12 }
   0x9   : > { %p223_p1 = scmp.eq.s32.totalorder %s222_s18, 0  ;;  %p236_p2 = scmp.eq.s32.totalorder %s1181_s8, 2 }
   0xa   : > { %p241_p3 = scmp.ne.s32.totalorder %s1092_s12, %s1088_s11  ;;  %p242_p4 = scmp.eq.s32.totalorder %s876_s15, 2 }
   0xb   : > { %s1196_s19 = scalar_select %p223_p1, %s1096_s13, %s225_s17  }
   0xc   : > { %p1198_p5 = por %p236_p2, %p235_p0  ;;  %p1202_p6 = por %p242_p4, %p241_p3 }
   0xd   : > { %p879_p7 = scmp.ge.s32.totalorder %s1100_s14, 1  ;;  %p291_p8 = scmp.lt.s32.totalorder %s1100_s14, 4 }
   0xf   : > { %p292_p9 = pnand %p879_p7, %p291_p8 }
  0x10   : > { %p325_p10 = scmp.lt.s32.totalorder (!%p292_p9), %s1181_s8, 2  ;;  %v329_v1 = vld [vmem:[%s1349_s1] sm:$0xff] (!%p292_p9)  ;;  %vm376_vm0 = vcmask (!%p292_p9), 15360   ;;  %v1102_v3 = vmov (!%p292_p9), 0   ;;  %v344_v4 = vld [vmem:[%s1350_s2 + $0x10] sm:$0xff] (!%p292_p9)  ;;  %vm389_vm1 = vcmask (!%p292_p9), 1041408  }
  0x11   : > { %295 = sbr.rel (%p292_p9) target bundleno = 939 (0x3ab), region = 56  ;;  %926 = vmatprep.mubr.msk.f32.mxu0 (!%p292_p9), %vm376_vm0, %v329_v1  ;;  %v342_v2 = vld [vmem:[%s1350_s2] sm:$0xff] (!%p292_p9)  ;;  %1036 = vset.pattern.permute.xlu0 (!%p292_p9), %v1102_v3  ;;  %v343_v5 = vld [vmem:[%s1350_s2 + $0x8] sm:$0xff] (!%p292_p9)  ;;  %v345_v6 = vld [vmem:[%s1350_s2 + $0x18] sm:$0xff] (!%p292_p9)  ;;  %vm502_vm2 = vcmask (!%p292_p9), 261120   ;;  %v1103_v0 = vmov (!%p292_p9), 0.0|0.0  }
  0x12   : > { %1037 = vset.pattern.permute.xlu1 (!%p292_p9), %v1102_v3  ;;  %358 = vperm.xlu0 (!%p292_p9), %1036, %v342_v2   ;;  %v330_v8 = vld [vmem:[%s1349_s1 + $0x8] sm:$0xff] (!%p292_p9)  ;;  %v331_v9 = vld [vmem:[%s1349_s1 + $0x10] sm:$0xff] (!%p292_p9)  ;;  %v346_v10 = vld [vmem:[%s1352_s4] sm:$0xff] (!%p292_p9)  ;;  %vm1104_vm3 = vmmov (!%p292_p9), 0   ;;  %v1105_v1 = vmov (!%p292_p9), 0.0   ;;  %s323_s25 = sand.u32 (!%p292_p9), 1, %s1092_s12  }
  0x13   : > { %368 = vperm.xlu1 (!%p292_p9), %1037, %v344_v4   ;;  %v347_v11 = vld [vmem:[%s1352_s4 + $0x8] sm:$0xff] (!%p292_p9)  ;;  %v332_v12 = vld [vmem:[%s1349_s1 + $0x18] sm:$0xff] (!%p292_p9)  ;;  %v348_v13 = vld [vmem:[%s1352_s4 + $0x10] sm:$0xff] (!%p292_p9)  ;;  %s324_s27 = scalar_lea.vmem (!%p292_p9), [#allocation3], %s323_s25  ;;  %s809_s15 = scalar_lea.sflag (!%p292_p9), [#allocation4], %s323_s25 }
  0x14   : > { %v349_v14 = vld [vmem:[%s1352_s4 + $0x18] sm:$0xff] (!%p292_p9)  ;;  %v350_v15 = vld [vmem:[%s1354_s6] sm:$0xff] (!%p292_p9)  ;;  %v351_v16 = vld [vmem:[%s1354_s6 + $0x8] sm:$0xff] (!%p292_p9)  ;;  %s821_s28 = sshll.u32 (!%p292_p9), %s324_s27, 4  ;;  %s1308_s28 = int_to_ptr.vmem [resolvable:$true] %s821_s28 }
  0x15   : > { %v352_v17 = vld [vmem:[%s1354_s6 + $0x10] sm:$0xff] (!%p292_p9)  ;;  %v353_v18 = vld [vmem:[%s1354_s6 + $0x18] sm:$0xff] (!%p292_p9)  ;;  %v354_v19 = vld [vmem:[#allocation2] sm:$0x1] (!%p292_p9)  ;;  %s1038_s17 = scalar_lea.vmem (!%p292_p9), %s1308_s28, 16 }
  0x16   : > { %363 = vperm.xlu0 (!%p292_p9), %1036, %v343_v5   ;;  %v333_v20 = vld [vmem:[%s1351_s3] sm:$0xff] (!%p292_p9)  ;;  %v334_v39 = vld [vmem:[%s1351_s3 + $0x8] sm:$0xff] (!%p292_p9)  ;;  %v335_v40 = vld [vmem:[%s1351_s3 + $0x10] sm:$0xff] (!%p292_p9)  ;;  %p1039_p11 = scmp.ne.s32.totalorder (!%p292_p9), %s1308_s28, %s1038_s17 }
  0x17   : > { %373 = vperm.xlu1 (!%p292_p9), %1037, %v345_v6   ;;  %940 = vmatprep.mubr.msk.f32.mxu1 (!%p292_p9), %vm502_vm2, %v333_v20  ;;  %v336_v41 = vld [vmem:[%s1351_s3 + $0x18] sm:$0xff] (!%p292_p9)  ;;  %v337_v42 = vld [vmem:[%s1353_s5] sm:$0xff] (!%p292_p9)  ;;  %v338_v61 = vld [vmem:[%s1353_s5 + $0x8] sm:$0xff] (!%p292_p9) }
  0x18   : > { %s326_s26 = scalar_select %p325_p10, %s1181_s8, 2  ;;  %v339_v62 = vld [vmem:[%s1353_s5 + $0x10] sm:$0xff]  ;;  %v340_v63 = vld [vmem:[%s1353_s5 + $0x18] sm:$0xff]  ;;  %v341_v20 = vld [vmem:[%s1355_s7] sm:$0x1] }
  0x19   : > { %p1040_p12 = pnand %p1039_p11, %p1198_p5 }
  0x1a   : > { %s880_s29 = sshll.u32 %s326_s26, 1  ;;  %484 = vperm.xlu0 %1036, %v346_v10   ;;  %s895_s26 = sshll.u32 %s1181_s8, 4 }
  0x1b   : > { %s328_s18 = scalar_lea.vmem %s1348_s0, %s880_s29  ;;  %489 = vperm.xlu1 %1037, %v347_v11   ;;  %s1306_s10 = scalar_lea.hbm %s1357_s9, %s895_s26 }
  0x1c   : > { %v355_v7 = vld [vmem:[%s328_s18] sm:$0x3]  ;;  %p1041_p13 = pneg %p1040_p12  ;;  %s1106_s8 = smov [#allocation3]  }
  0x1d   : > { %924 = vmatprep.subr.msk.mxu0 %vm389_vm1, %v355_v7  ;;  %s1042_s18 = sshll.u32 %s1106_s8, 4  ;;  %s1043_s18 = int_to_ptr.vmem [resolvable:$false] %s1042_s18 }
  0x1e   : > { %925 = vmatpush3.msk.msra.mxu0 %vm389_vm1, %v355_v7  ;;  %494 = vperm.xlu0 %1036, %v348_v13   ;;  %s1044_s22 = scalar_lea.vmem %s1043_s18, 32  ;;  %p1045_p0 = scmp.lt.s32.totalorder %s1308_s28, %s1043_s18 }
  0x1f   : > { %927 = vmatmul.mubr.msk.f32.vlgmr.msra.gmra.mrb[0].mxu0 %vm376_vm0, %v330_v8  ;;  %499 = vperm.xlu1 %1037, %v349_v14   ;;  %p1046_p1 = scmp.lt.s32.totalorder %s1044_s22, %s1038_s17 }
  0x20   : > { %929 = vmatprep.mubr.msk.f32.mxu0 %vm376_vm0, %v331_v9 }
  0x21   : > { %p1047_p2 = por %p1046_p1, %p1045_p0 }
  0x22   : > { %606 = vperm.xlu0 %1036, %v350_v15  }
  0x23   : > { %930 = vmatmul.mubr.msk.f32.gmra.mrb[2].mxu0 %vm376_vm0, %v332_v12  ;;  %611 = vperm.xlu1 %1037, %v351_v16   ;;  %p1048_p3 = pnand %p1047_p2, %p1041_p13 }
  0x24   : > { %954 = vmatprep.mubr.msk.f32.mxu0 %vm502_vm2, %v337_v42 }
  0x26   : > { %616 = vperm.xlu0 %1036, %v352_v17  }
  0x27   : > { %621 = vperm.xlu1 %1037, %v353_v18  }
  0x2a   : > { %727 = vperm.xlu0 %1036, %v354_v19  }
  0x91   : > { %v359_v21 = vpop.permute.xlu0 %358 }
  0x92   : > { %v369_v22 = vpop.permute.xlu1 %368 }
  0x95   : > { %v364_v23 = vpop.permute.xlu0 %363 }
  0x96   : > { %v374_v29 = vpop.permute.xlu1 %373 }
  0x99   : > { %v485_v44 = vpop.permute.xlu0 %484 }
  0x9a   : > { %v490_v43 = vpop.permute.xlu1 %489 }
  0x9d   : > { %v495_v53 = vpop.permute.xlu0 %494 }
  0x9e   : > { %v500_v50 = vpop.permute.xlu1 %499 }
  0xa1   : > { %v607_v3 = vpop.permute.xlu0 %606 }
  0xa2   : > { %v612_v2 = vpop.permute.xlu1 %611 }
  0xa5   : > { %v617_v12 = vpop.permute.xlu0 %616 }
  0xa6   : > { %v622_v9 = vpop.permute.xlu1 %621 }
  0xf2   : > { %v928_v24 = vpop.f32.mrb[0].mxu0 }
  0xf3   : > { %v465_v25 = vadd.f32 %v928_v24, %v364_v23  ;;  %v459_v26 = vpop.f32.mrb[1].mxu0  ;;  %v728_v24 = vpop.permute.xlu0 %727 }
  0xf4   : > { %v460_v27 = vadd.f32 %v459_v26, %v359_v21  ;;  %v730_v21 = vlaneseq }
  0xf5   : > { %v479_v28 = vmax.f32 %v465_v25, 0.0 }
  0xf6   : > { %v478_v30 = vmax.f32 %v460_v27, 0.0  ;;  %v931_v31 = vpop.f32.mrb[2].mxu0 }
  0xf7   : > { %v475_v32 = vadd.f32 %v931_v31, %v374_v29  ;;  %v469_v33 = vpop.f32.mrb[3].mxu0 }
  0xf8   : > { %v470_v34 = vadd.f32 %v469_v33, %v369_v22  ;;  %v971_v35 = vpack.c.bf16 %v479_v28, %v478_v30  ;;  %v731_v22 = vshrl.u32 %v730_v21, 7 }
  0xf9   : > { %v481_v36 = vmax.f32 %v475_v32, 0.0 }
  0xfa   : > { %v480_v37 = vmax.f32 %v470_v34, 0.0  ;;  %972 = vmatprep.subr.bf16.mxu1 %v971_v35  ;;  %v732_v23 = vsub.s32 0, %v731_v22 }
  0xfb   : > { %974 = vmatpush3.bf16.msra.mxu1 %v971_v35 }
  0xfc   : > { %v975_v38 = vpack.c.bf16 %v481_v36, %v480_v37  ;;  %v733_v25 = vrot.slane %v728_v24, %v732_v23 }
  0xfe   : > { %976 = vmatprep.subr.bf16.mxu1 %v975_v38 }
  0xff   : > { %978 = vmatpush3.bf16.msra.mxu1 %v975_v38 }
 0x100   : > { %987 = vmatprep.subr.bf16.mxu1 %v1103_v0 }
 0x102   : > { %941 = vmatmul.mubr.msk.f32.vlgmr.msra.gmra.mrb[0].mxu1 %vm502_vm2, %v334_v39 }
 0x103   : > { %943 = vmatprep.mubr.msk.f32.mxu1 %vm502_vm2, %v335_v40 }
 0x106   : > { %944 = vmatmul.mubr.msk.f32.gmra.mrb[2].mxu1 %vm502_vm2, %v336_v41 }
 0x107   : > { %968 = vmatprep.mubr.msk.f32.mxu1 %vm1104_vm3, %v1105_v1 }
 0x1d5   : > { %v942_v45 = vpop.f32.mrb[0].mxu1 }
 0x1d6   : > { %v587_v46 = vadd.f32 %v942_v45, %v490_v43  ;;  %v581_v47 = vpop.f32.mrb[1].mxu1 }
 0x1d7   : > { %v582_v48 = vadd.f32 %v581_v47, %v485_v44 }
 0x1d8   : > { %v601_v49 = vmax.f32 %v587_v46, 0.0 }
 0x1d9   : > { %v600_v51 = vmax.f32 %v582_v48, 0.0  ;;  %v945_v52 = vpop.f32.mrb[2].mxu1 }
 0x1da   : > { %v597_v54 = vadd.f32 %v945_v52, %v500_v50  ;;  %v591_v55 = vpop.f32.mrb[3].mxu1 }
 0x1db   : > { %v979_v56 = vpack.c.bf16 %v601_v49, %v600_v51  ;;  %v592_v57 = vadd.f32 %v591_v55, %v495_v53 }
 0x1dc   : > { %v603_v58 = vmax.f32 %v597_v54, 0.0 }
 0x1dd   : > { %v602_v59 = vmax.f32 %v592_v57, 0.0  ;;  %980 = vmatprep.subr.bf16.mxu0 %v979_v56 }
 0x1de   : > { %982 = vmatpush3.bf16.msra.mxu0 %v979_v56 }
 0x1df   : > { %v983_v60 = vpack.c.bf16 %v603_v58, %v602_v59 }
 0x1e1   : > { %984 = vmatprep.subr.bf16.mxu0 %v983_v60 }
 0x1e2   : > { %986 = vmatpush3.bf16.msra.mxu0 %v983_v60 }
 0x1e5   : > { %955 = vmatmul.mubr.msk.f32.vlgmr.msra.gmra.mrb[4].mxu0 %vm502_vm2, %v338_v61 }
 0x1e6   : > { %957 = vmatprep.mubr.msk.f32.mxu0 %vm502_vm2, %v339_v62 }
 0x1e9   : > { %958 = vmatmul.mubr.msk.f32.gmra.mrb[6].mxu0 %vm502_vm2, %v340_v63 }
 0x2b8   : > { %v956_v4 = vpop.f32.mrb[4].mxu0 }
 0x2b9   : > { %v708_v5 = vadd.f32 %v956_v4, %v612_v2  ;;  %v702_v6 = vpop.f32.mrb[5].mxu0 }
 0x2ba   : > { %v703_v7 = vadd.f32 %v702_v6, %v607_v3 }
 0x2bb   : > { %v722_v8 = vmax.f32 %v708_v5, 0.0 }
 0x2bc   : > { %v721_v10 = vmax.f32 %v703_v7, 0.0  ;;  %v959_v11 = vpop.f32.mrb[6].mxu0 }
 0x2bd   : > { %v718_v13 = vadd.f32 %v959_v11, %v622_v9  ;;  %v712_v14 = vpop.f32.mrb[7].mxu0 }
 0x2be   : > { %v988_v15 = vpack.c.bf16 %v722_v8, %v721_v10  ;;  %v713_v16 = vadd.f32 %v712_v14, %v617_v12 }
 0x2bf   : > { %v724_v17 = vmax.f32 %v718_v13, 0.0 }
 0x2c0   : > { %v723_v18 = vmax.f32 %v713_v16, 0.0  ;;  %989 = vmatpush3.bf16.msra.mxu1 %v988_v15 }
 0x2c1   : > { %990 = vmatprep.subr.bf16.mxu1 %v1103_v0 }
 0x2c2   : > { %v991_v19 = vpack.c.bf16 %v724_v17, %v723_v18 }
 0x2c4   : > { %992 = vmatpush3.bf16.msra.mxu1 %v991_v19 }
 0x2c7   : > { %969 = vmatmul.mubr.msk.f32.vlgmr.msra.gmra.mrb[4].mxu1 %vm502_vm2, %v341_v20 }
 0x39a   : > { %v803_v26 = vpop.f32.mrb[4].mxu1 }
 0x39b   : > { %v804_v27 = vadd.f32 %v803_v26, %v733_v25  ;;  %v970_v28 = vpop.f32.mrb[5].mxu1 }
 0x39d   : > { %807 = vst [vmem:[%s324_s27] sm:$0x1] %v804_v27 }
 0x39e   : > { %1051 = shalt.err (!%p1048_p3)
}
 0x39f   : > { %s1052_s23 = scalar_lea.hbm %s1306_s10, 16  ;;  %s1056_s26 = scalar_lea.hbm %s1357_s9, 48 }
 0x3a0   : > { %p1053_p4 = scmp.ne.s32.totalorder %s1306_s10, %s1052_s23  ;;  %p1057_p9 = scmp.lt.u32.totalorder %s1306_s10, %s1357_s9 }
 0x3a1   : > { %p1058_p10 = scmp.lt.u32.totalorder %s1056_s26, %s1052_s23  ;;  %p1060_p12 = scmp.lt.u32.totalorder %s1052_s23, %s1306_s10 }
 0x3a2   : > { %p1054_p7 = pnand %p1053_p4, %p1198_p5 }
 0x3a3   : > { %p1059_p11 = por %p1058_p10, %p1057_p9 }
 0x3a4   : > { %p1055_p8 = pneg %p1054_p7 }
 0x3a5   : > { %p1061_p13 = por %p1060_p12, %p1059_p11 }
 0x3a7   : > { %p1062_p0 = pnand %p1061_p13, %p1055_p8 }
 0x3a9   : > { %1065 = shalt.err (!%p1062_p0)
}
 0x3aa   : > { %993 = dma.vmem_to_hbm [thread:$0]  (%p1198_p5), %s1308_s28, 16, %s1306_s10, %s809_s15  }
 0x3ab PF: > { %p999_p1 = scmp.ge.s32.totalorder %s1100_s14, 2  ;;  %s833_s29 = sand.u32 1, %s1088_s11  }
 0x3ac   : > { %s834_s17 = scalar_lea.sflag [#allocation4], %s833_s29 }
 0x3ad   : > { %p996_p2 = pnand %p999_p1, %p1202_p6 }
 0x3af   : > { %1083 = dma.done.wait (!%p996_p2), %s834_s17, 16  }
 0x3b0   : > { %1085 = vsyncadd (!%p996_p2), %s834_s17, 4294967280  ;;  %p21_p3 = scmp.ge.s32.totalorder %s1185_s16, 5   ;;  %s1360_s11 = smov %s1092_s12 }
 0x3b1   : > { %s1361_s12 = smov %s1096_s13  ;;  %s1362_s13 = smov %s1196_s19 }
 0x3b2   : > { %s1363_s14 = smov %s1185_s16  ;;  %23 = sbr.rel (!%p21_p3) target bundleno = 6 (0x6), region = 91 }
 0x3b9   :  { %838 = vsyncpa [#allocation4], 1 }
 0x3ba   :  { %840 = vsyncpa [#allocation4 + $0x1], 1 }

</bundles_post_ra>
